<compile_context>
chip_gen: v5e
topology: v5e:2x2
jax: 0.10.0
libtpu: 0.0.40
codegen_flags: <defaults>
</compile_context>

<pallas_src>
import functools

import jax
import jax.numpy as jnp
from jax.experimental import pallas as pl
from jax.experimental.pallas import tpu as pltpu

E_DIM = 768    # XLNet hidden size
F_DIM = 128    # logits_proj output size (GRU input size)
H_DIM = 64     # real GRU hidden size per direction
H_PAD = 128    # lane-padded hidden size used inside the kernel


# ---------------- stage 1: masked mean pool, streamed over (B, C) -----------

def pool_kernel(emb_ref, mask_ref, out_ref):
    # emb_ref : [L, E] bf16   (one (batch, count) tile)
    # mask_ref: [1, L] f32
    # out_ref : [1, E] f32    (written to pooled[count, batch])
    m = mask_ref[...]                                              # [1, L]
    # masked token sum as an MXU contraction (keeps VPU/XLU slots free,
    # bf16 stays off the VPU -> also fine on v5e)
    s = jnp.dot(m.astype(emb_ref.dtype), emb_ref[...],
                preferred_element_type=jnp.float32)                # [1, E]
    cnt = jnp.maximum(jnp.sum(m, axis=1, keepdims=True), 1.0)      # [1, 1]
    out_ref[...] = s * pl.reciprocal(cnt, approx=True)             # EUP slot


# ---------------- stage 2: projection + bidirectional GRU + fc --------------

def gru_fc_kernel(pooled_ref, wp_ref, bp_ref,
                  wih_f_ref, whh_f_ref, bih_f_ref, bhh_f_ref,
                  wih_b_ref, whh_b_ref, bih_b_ref, bhh_b_ref,
                  wfc_f_ref, wfc_b_ref, bfc_ref, out_ref,
                  *, batch, count):
    B, C = batch, count
    Hp = whh_f_ref.shape[0]                  # 128 (lane-padded hidden)

    # pooled rows are laid out [count, batch]: row index = c*B + b
    pooled = pooled_ref[...]                                       # [C*B, E]

    # single hoisted 768->128 projection for every (count, batch) row
    proj = jnp.dot(pooled, wp_ref[...],
                   preferred_element_type=jnp.float32) + bp_ref[...]      # [C*B, F]

    # input-side forward-GRU gates for ALL timesteps in one matmul
    gi_f = jnp.dot(proj, wih_f_ref[...],
                   preferred_element_type=jnp.float32) + bih_f_ref[...]   # [C*B, 3Hp]

    def gru_step(gi, h, whh_ref, bhh_ref):
        # PyTorch GRU cell, gate order (r, z, n); Hp-wide lane-aligned slices
        gh = jnp.dot(h, whh_ref[...],
                     preferred_element_type=jnp.float32) + bhh_ref[...]   # [B, 3Hp]
        r = jax.nn.sigmoid(gi[:, 0:Hp] + gh[:, 0:Hp])
        z = jax.nn.sigmoid(gi[:, Hp:2 * Hp] + gh[:, Hp:2 * Hp])
        n = jnp.tanh(gi[:, 2 * Hp:3 * Hp] + r * gh[:, 2 * Hp:3 * Hp])
        return (1.0 - z) * n + z * h

    # forward direction over the sequence [enc(C-1), enc(C-2), ..., enc(0)]
    # (the PyTorch loop appends counts in reverse order before stacking)
    h_f = jnp.zeros((B, Hp), jnp.float32)
    for t in range(C):                       # small static trip count (unrolled)
        c = C - 1 - t
        h_f = gru_step(gi_f[c * B:(c + 1) * B, :], h_f, whh_f_ref, bhh_f_ref)

    # backward half of x[:, -1] == one backward-GRU step on the last seq
    # element, which is encode(count 0)  (rows 0:B in the [count, batch] layout)
    gi_b = jnp.dot(proj[0:B, :], wih_b_ref[...],
                   preferred_element_type=jnp.float32) + bih_b_ref[...]
    h_b = gru_step(gi_b, jnp.zeros((B, Hp), jnp.float32), whh_b_ref, bhh_b_ref)

    # fc(concat([h_f, h_b], -1)) without an in-kernel concat: split weights
    out_ref[...] = (jnp.dot(h_f, wfc_f_ref[...], preferred_element_type=jnp.float32)
                    + jnp.dot(h_b, wfc_b_ref[...], preferred_element_type=jnp.float32)
                    + bfc_ref[...])


# ---------------- wrapper ----------------------------------------------------

def text_split_forward(txt, attention_mask, params):
    """txt: int32 [B, Count, Len], attention_mask: [B, Count, Len] -> [B, 2]."""
    B, C, L = txt.shape

    # glue: bf16 embedding gather stays in plain JAX (halves HBM bytes vs f32)
    # TODO(synk): the gather still materializes [B,C,L,E] in HBM; a scalar-
    # prefetched in-kernel DMA gather from emb_table would remove one HBM pass.
    emb = params["emb_table"][txt]                                 # [B,C,L,E] bf16
    mask = attention_mask.astype(jnp.float32).reshape(B, C, 1, L)  # [B,C,1,L] f32

    # --- stage 1: streamed masked mean pool -> pooled[count, batch, :] ------
    pooled = pl.pallas_call(
        pool_kernel,
        out_shape=jax.ShapeDtypeStruct((C, B, 1, E_DIM), jnp.float32),
        grid=(B, C),
        in_specs=[
            pl.BlockSpec((pl.Squeezed(), pl.Squeezed(), L, E_DIM),
                         lambda b, c: (b, c, 0, 0)),
            pl.BlockSpec((pl.Squeezed(), pl.Squeezed(), 1, L),
                         lambda b, c: (b, c, 0, 0)),
        ],
        # reorder to [count, batch] via the output index_map (free, lane-dense)
        out_specs=pl.BlockSpec((pl.Squeezed(), pl.Squeezed(), 1, E_DIM),
                               lambda b, c: (c, b, 0, 0)),
        compiler_params=pltpu.CompilerParams(
            dimension_semantics=("parallel", "parallel")),
    )(emb, mask)
    pooled = pooled.reshape(C * B, E_DIM)

    # --- stage 2: projection + GRU + fc, everything resident in VMEM --------
    vmem = pl.BlockSpec(memory_space=pltpu.MemorySpace.VMEM)
    args = (pooled, params["wp"], params["bp"],
            params["wih_f"], params["whh_f"], params["bih_f"], params["bhh_f"],
            params["wih_b"], params["whh_b"], params["bih_b"], params["bhh_b"],
            params["wfc_f"], params["wfc_b"], params["bfc"])
    return pl.pallas_call(
        functools.partial(gru_fc_kernel, batch=B, count=C),
        out_shape=jax.ShapeDtypeStruct((B, 2), jnp.float32),
        in_specs=[vmem] * len(args),
        out_specs=vmem,
    )(*args)


# ---------------- parameter construction ------------------------------------

def _pad_gate_cols(w, h, hp):
    """[rows, 3h] -> [rows, 3hp]: each (r,z,n) gate block placed at g*hp."""
    rows = w.shape[0]
    out = jnp.zeros((rows, 3 * hp), w.dtype)
    for g in range(3):
        out = out.at[:, g * hp:g * hp + h].set(w[:, g * h:(g + 1) * h])
    return out


def init_params(key, vocab):
    ks = jax.random.split(key, 6)
    s = 0.05
    p = {}
    # bf16 embedding table: halves the dominant HBM traffic
    p["emb_table"] = (jax.random.normal(ks[0], (vocab, E_DIM), jnp.float32)
                      * s).astype(jnp.bfloat16)
    # logits_proj: Linear(768, 128) — stored pre-transposed [in, out]
    p["wp"] = jax.random.normal(ks[1], (E_DIM, F_DIM), jnp.float32) * s
    p["bp"] = jnp.zeros((1, F_DIM), jnp.float32)

    def gru_dir(k):
        k1, k2, k3, k4 = jax.random.split(k, 4)
        wih = jax.random.normal(k1, (F_DIM, 3 * H_DIM), jnp.float32) * s   # W_ih^T
        whh = jax.random.normal(k2, (H_DIM, 3 * H_DIM), jnp.float32) * s   # W_hh^T
        bih = jax.random.normal(k3, (1, 3 * H_DIM), jnp.float32) * s
        bhh = jax.random.normal(k4, (1, 3 * H_DIM), jnp.float32) * s
        # lane-pad H (64) -> H_PAD (128); padded hidden units provably stay 0
        wih_p = _pad_gate_cols(wih, H_DIM, H_PAD)                          # [F, 3Hp]
        whh_p = jnp.zeros((H_PAD, 3 * H_PAD), jnp.float32)
        whh_p = whh_p.at[:H_DIM].set(_pad_gate_cols(whh, H_DIM, H_PAD))    # [Hp, 3Hp]
        bih_p = _pad_gate_cols(bih, H_DIM, H_PAD)
        bhh_p = _pad_gate_cols(bhh, H_DIM, H_PAD)
        return wih_p, whh_p, bih_p, bhh_p

    p["wih_f"], p["whh_f"], p["bih_f"], p["bhh_f"] = gru_dir(ks[2])
    p["wih_b"], p["whh_b"], p["bih_b"], p["bhh_b"] = gru_dir(ks[3])

    # fc: Linear(128, 2) — pre-transposed [2H, 2], split into fwd/bwd halves,
    # rows zero-padded to H_PAD
    wfc = jax.random.normal(ks[4], (2 * H_DIM, 2), jnp.float32) * s
    p["wfc_f"] = jnp.zeros((H_PAD, 2), jnp.float32).at[:H_DIM].set(wfc[:H_DIM])
    p["wfc_b"] = jnp.zeros((H_PAD, 2), jnp.float32).at[:H_DIM].set(wfc[H_DIM:])
    p["bfc"] = jnp.zeros((1, 2), jnp.float32)
    return p


if __name__ == "__main__":
    key = jax.random.PRNGKey(0)
    B, C, L, VOCAB = 2, 8, 16, 50
    kp, kt = jax.random.split(key)

    params = init_params(kp, VOCAB)
    txt = jax.random.randint(kt, (B, C, L), 0, VOCAB, dtype=jnp.int32)
    lengths = 4 + (jnp.arange(C) % (L - 4))                        # per-count lengths
    attention_mask = (jnp.arange(L)[None, None, :] <
                      lengths[None, :, None]).astype(jnp.int32)    # [1, C, L]
    attention_mask = jnp.broadcast_to(attention_mask, (B, C, L))

    out = jax.block_until_ready(text_split_forward(txt, attention_mask, params))
    assert out.shape == (B, 2)
    assert bool(jnp.all(jnp.isfinite(out)))
    print("KERNEL_OK")
</pallas_src>

<mosaic_0001>
module attributes {stable_mosaic.version = 11 : i64} {
  func.func @pool_kernel(%arg0: i32, %arg1: i32, %arg2: memref<1x1x16x768xbf16, #tpu.memory_space<vmem>>, %arg3: memref<1x1x1x16xf32, #tpu.memory_space<vmem>>, %arg4: memref<1x1x1x768xf32, #tpu.memory_space<vmem>>) attributes {dimension_semantics = [#tpu.dimension_semantics<parallel>, #tpu.dimension_semantics<parallel>], iteration_bounds = array<i64: 2, 8>, scalar_prefetch = 0 : i64, scratch_operands = 0 : i64, tpu.core_type = #tpu.core_type<tc>, window_params = [{transform_indices = @transform_0, window_bounds = array<i64: 1, 1, 16, 768>}, {transform_indices = @transform_1, window_bounds = array<i64: 1, 1, 1, 16>}, {transform_indices = @transform_2, window_bounds = array<i64: 1, 1, 1, 768>}]} {
    %c0 = arith.constant 0 : index
    %c0_0 = arith.constant 0 : index
    %c0_1 = arith.constant 0 : index
    %c0_2 = arith.constant 0 : index
    %0 = vector.load %arg3[%c0, %c0_0, %c0_1, %c0_2] : memref<1x1x1x16xf32, #tpu.memory_space<vmem>>, vector<1x1x1x16xf32>
    %1 = vector.shape_cast %0 : vector<1x1x1x16xf32> to vector<1x16xf32>
    %2 = arith.truncf %1 : vector<1x16xf32> to vector<1x16xbf16>
    %c0_3 = arith.constant 0 : index
    %c0_4 = arith.constant 0 : index
    %c0_5 = arith.constant 0 : index
    %c0_6 = arith.constant 0 : index
    %3 = vector.load %arg2[%c0_3, %c0_4, %c0_5, %c0_6] : memref<1x1x16x768xbf16, #tpu.memory_space<vmem>>, vector<1x1x16x768xbf16>
    %4 = vector.shape_cast %3 : vector<1x1x16x768xbf16> to vector<16x768xbf16>
    %cst = arith.constant dense<0.000000e+00> : vector<1x768xf32>
    %5 = tpu.matmul %2, %4, %cst {dimension_numbers = #tpu.dot_dimension_numbers<[1], [0], [0], [1], [0, 0, 1, 1], [], []>} : vector<1x16xbf16>, vector<16x768xbf16>, vector<1x768xf32> -> vector<1x768xf32>
    %cst_7 = arith.constant dense<0.000000e+00> : vector<1xf32>
    %6 = vector.multi_reduction <add>, %1, %cst_7 [1] : vector<1x16xf32> to vector<1xf32>
    %7 = vector.shape_cast %6 : vector<1xf32> to vector<1x1xf32>
    %cst_8 = arith.constant 1.000000e+00 : f32
    %8 = vector.broadcast %cst_8 : f32 to vector<1x1xf32>
    %9 = arith.maximumf %7, %8 : vector<1x1xf32>
    %10 = tpu.reciprocal %9 {approx = true} : vector<1x1xf32> -> vector<1x1xf32>
    %11 = vector.broadcast %10 : vector<1x1xf32> to vector<1x768xf32>
    %12 = arith.mulf %5, %11 : vector<1x768xf32>
    %c0_9 = arith.constant 0 : index
    %c0_10 = arith.constant 0 : index
    %c0_11 = arith.constant 0 : index
    %c0_12 = arith.constant 0 : index
    %13 = vector.load %arg4[%c0_9, %c0_10, %c0_11, %c0_12] : memref<1x1x1x768xf32, #tpu.memory_space<vmem>>, vector<1x1x1x768xf32>
    %14 = vector.shape_cast %13 : vector<1x1x1x768xf32> to vector<1x768xf32>
    %15 = vector.shape_cast %12 : vector<1x768xf32> to vector<1x1x1x768xf32>
    tpu.vector_store %arg4[%c0_9, %c0_10, %c0_11, %c0_12], %15 {strides = array<i32>} : memref<1x1x1x768xf32, #tpu.memory_space<vmem>>, vector<1x1x1x768xf32>,
    return
  }
  func.func @transform_0(%arg0: i32, %arg1: i32) -> (i32, i32, i32, i32) {
    %c0_i32 = arith.constant 0 : i32
    %c0_i32_0 = arith.constant 0 : i32
    %c0_i32_1 = arith.constant 0 : i32
    return %arg0, %arg1, %c0_i32, %c0_i32_0 : i32, i32, i32, i32
  }
  func.func @transform_1(%arg0: i32, %arg1: i32) -> (i32, i32, i32, i32) {
    %c0_i32 = arith.constant 0 : i32
    %c0_i32_0 = arith.constant 0 : i32
    %c0_i32_1 = arith.constant 0 : i32
    return %arg0, %arg1, %c0_i32, %c0_i32_0 : i32, i32, i32, i32
  }
  func.func @transform_2(%arg0: i32, %arg1: i32) -> (i32, i32, i32, i32) {
    %c0_i32 = arith.constant 0 : i32
    %c0_i32_0 = arith.constant 0 : i32
    %c0_i32_1 = arith.constant 0 : i32
    return %arg1, %arg0, %c0_i32, %c0_i32_0 : i32, i32, i32, i32
  }
}

</mosaic_0001>

<bundles_post_ra>
// kernel: tpu_custom_call.1
= control target key start
LH: loop header
LB: loop body
LE: loop exit
PB: predicated region body
PF: predicated region fallthrough
CT: control target
= control target key end

     0   :  { %7 = vsyncpa [#allocation3], 0  ;;  %s1004_s0 = inlined_call_operand.hbm [shape: bf16[2,8,16,768], index: 0, kind: input, shape index: {}]   ;;  %s1005_s1 = inlined_call_operand.hbm [shape: f32[2,8,1,16], index: 1, kind: input, shape index: {}]   ;;  %s1006_s2 = inlined_call_operand.hbm [shape: f32[8,2,1,768], index: 2, kind: output, shape index: {}]  }
   0x1   :  { %9 = vsyncpa [#allocation3 + $0x1], 0 }
   0x2   :  { %10 = vsyncpa [#allocation6], 0 }
   0x3   :  { %12 = vsyncpa [#allocation6 + $0x1], 0 }
   0x4   :  { %13 = vsyncpa [#allocation4], 0 }
   0x5   :  { %15 = vsyncpa [#allocation4 + $0x1], 0  ;;  %s826_s9 = smov 0   ;;  %s828_s10 = smov 0  }
   0x6   :  { %s830_s11 = smov 0   ;;  %s832_s12 = smov 0  }
   0x7   :  { %s834_s13 = smov 0   ;;  %s836_s14 = smov 0  }
   0x8   :  { %s838_s15 = smov 0   ;;  %s840_s16 = smov 0  }
   0x9 LB: > { %s506_s17 = sadd.s32 4294967295, %s807_s16   ;;  %s507_s18 = sadd.s32 4294967294, %s807_s16   ;;  %s807_s16 = sphi %s840_s16, %s21_s16   ;;  %s803_s15 = sphi %s838_s15, %s1026_s15   ;;  %s799_s14 = sphi %s836_s14, %s1025_s14   ;;  %s795_s13 = sphi %s834_s13, %s1024_s13   ;;  %s791_s12 = sphi %s832_s12, %s1023_s12   ;;  %s787_s11 = sphi %s830_s11, %s1022_s11   ;;  %s783_s10 = sphi %s828_s10, %s1021_s10   ;;  %s779_s9 = sphi %s826_s9, %s1020_s9  }
   0xa   : > { %s30_s19 = sadd.s32 1, %s799_s14  ;;  %s33_s20 = sadd.s32 1, %s803_s15 }
   0xb   : > { %p31_p0 = scmp.ge.s32.totalorder %s30_s19, 8  ;;  %s42_s21 = sadd.s32 1, %s787_s11 }
   0xc   : > { %p49_p1 = scmp.ne.s32.totalorder %s787_s11, %s783_s10  ;;  %p50_p2 = scmp.eq.s32.totalorder %s807_s16, 0 }
   0xd   : > { %s1028_s19 = smov (%p31_p0, %s30_s19), 0  ;;  %s1030_s20 = smov (!%p31_p0, %s33_s20), %s803_s15 }
   0xe   : > { %1009 = sst [smem:[#allocation11_spill]] %s1028_s19  ;;  %s38_s22 = ssub.s32 %s799_s14, %s1028_s19 }
   0xf   : > { %p879_p3 = por %p50_p2, %p49_p1  ;;  %p35_p4 = scmp.ge.s32.totalorder %s1030_s20, 2 }
  0x10   : > { %p55_p5 = scmp.ne.s32.totalorder %s783_s10, %s779_s9  ;;  %p56_p6 = scmp.eq.s32.totalorder %s506_s17, 0 }
  0x11   : > { %p109_p7 = scmp.eq.s32.totalorder %s506_s17, 15  ;;  %s1032_s20 = smov (%p35_p4, %s1030_s20), 0 }
  0x12   : > { %1011 = sst [smem:[#allocation12_spill]] %s1032_s20  ;;  %p887_p8 = por %p56_p6, %p55_p5 }
  0x13   : > { %p891_p9 = por %p109_p7, %p49_p1  ;;  %s37_s26 = ssub.s32 %s803_s15, %s1032_s20 }
  0x14   : > { %p115_p10 = scmp.eq.s32.totalorder %s507_s18, 15  ;;  %s39_s27 = sor.u32 %s38_s22, %s37_s26 }
  0x15   : > { %p40_p11 = scmp.eq.s32.totalorder %s39_s27, 0  ;;  %p575_p13 = scmp.lt.s32.totalorder %s807_s16, 16 }
  0x16   : > { %p897_p12 = por %p115_p10, %p55_p5  ;;  %s903_s29 = sand.u32 1, %s787_s11  }
  0x17   : > { %s906_s30 = scalar_select %p40_p11, %s787_s11, %s42_s21  }
  0x18   : > { %s551_s3 = smul.u32 48, %s903_s29  ;;  %p912_p0 = pnand %p575_p13, %p879_p3 }
  0x19   : > { %1015 = sst [smem:[#allocation13_spill]] %s906_s30  ;;  %s552_s4 = smul.u32 12, %s799_s14 }
  0x1a   : > { %s553_s6 = smul.u32 96, %s803_s15  ;;  %s139_s7 = scalar_lea.vmem [#allocation2], %s551_s3 }
  0x1b   : > { %s149_s8 = sshll.u32 %s139_s7, 4  ;;  %p512_p1 = scmp.ge.s32.totalorder %s807_s16, 1  ;;  %s150_s8 = int_to_ptr.vmem [resolvable:$true] %s149_s8 }
  0x1c   : > { %s144_s17 = sadd.s32 %s553_s6, %s552_s4  ;;  %p176_p2 = scmp.lt.s32.totalorder %s807_s16, 17 }
  0x1d   : > { %s510_s18 = sshll.u32 %s144_s17, 2  ;;  %s136_s23 = scalar_lea.sflag [#allocation3], %s903_s29 }
  0x1e   : > { %s146_s26 = scalar_lea.hbm %s1004_s0, %s510_s18  ;;  %s809_s20 = smov 384  }
  0x1f   : > { %s147_s27 = sshll.u32 %s146_s26, 4  ;;  %s810_s19 = smov 24   ;;  %s148_s27 = int_to_ptr.hbm [resolvable:$true] %s147_s27 }
  0x20   : > { %567 = dma.hbm_to_vmem [thread:$0]  (!%p912_p0), %s148_s27, 768, %s150_s8, %s136_s23, %s809_s20, %s809_s20, %s810_s19  }
  0x21   : > { %p177_p3 = pnand %p512_p1, %p176_p2  ;;  %s511_s3 = sshll.u32 %s803_s15, 3 }
  0x22   : > { %s166_s4 = sadd.s32 %s799_s14, %s511_s3  ;;  %s162_s6 = scalar_lea.vmem [#allocation5], %s903_s29 }
  0x23   : > { %s171_s7 = sshll.u32 %s162_s6, 4  ;;  %s167_s18 = scalar_lea.hbm %s1005_s1, %s166_s4  ;;  %s172_s7 = int_to_ptr.vmem [resolvable:$true] %s171_s7 }
  0x24   : > { %s169_s22 = sshll.u32 %s167_s18, 4  ;;  %s160_s21 = scalar_lea.sflag [#allocation6], %s903_s29  ;;  %s170_s22 = int_to_ptr.hbm [resolvable:$true] %s169_s22 }
  0x25   : > { %570 = dma.hbm_to_vmem [thread:$0]  (!%p912_p0), %s170_s22, 16, %s172_s7, %s160_s21  }
  0x26   : > { %180 = sbr.rel (%p177_p3) target bundleno = 205 (0xcd), region = 28  ;;  %s935_s26 = sand.u32 (!%p177_p3), 1, %s783_s10  }
  0x27   : > { %s554_s19 = smul.u32 (!%p177_p3), 48, %s935_s26  ;;  %s183_s20 = scalar_lea.sflag (!%p177_p3), [#allocation3], %s935_s26 }
  0x29   : > { %s186_s8 = scalar_lea.vmem (!%p177_p3), [#allocation2], %s554_s19 }
  0x2b   : > { %766 = dma.done.wait (%p887_p8), %s183_s20, 768  }
  0x2c   : > { %768 = vsyncadd (%p887_p8), %s183_s20, 4294966528  ;;  %s193_s29 = scalar_lea.sflag [#allocation6], %s935_s26  ;;  %s195_s30 = scalar_lea.vmem [#allocation5], %s935_s26 }
  0x2d   : > { %770 = dma.done.wait (%p887_p8), %s193_s29, 16  }
  0x2e   : > { %772 = vsyncadd (%p887_p8), %s193_s29, 4294967280  ;;  %vm260_vm0 = vcmask 130048   ;;  %vm342_vm1 = vcmask 122880   ;;  %v515_v0 = vld [vmem:[%s186_s8] sm:$0xf]  ;;  %s556_s24 = smul.u32 6, %s795_s13  ;;  %v376_v40 = vlaneseq }
  0x2f   : > { %v548_v1 = vld [vmem:[%s186_s8 + $0x14] sm:$0xf0]  ;;  %v545_v2 = vld [vmem:[%s186_s8 + $0x4] sm:$0xf]  ;;  %v517_v4 = vld [vmem:[%s186_s8 + $0x18] sm:$0xf0] }
  0x30   : > { %v516_v3 = vor.u32 %v548_v1, %v515_v0  ;;  %v523_v5 = vld [vmem:[%s186_s8 + $0x8] sm:$0xf]  ;;  %v549_v6 = vld [vmem:[%s186_s8 + $0x1c] sm:$0xf0]  ;;  %v520_v7 = vor.u32 %v545_v2, %v517_v4  ;;  %v546_v9 = vld [vmem:[%s186_s8 + $0xc] sm:$0xf] }
  0x31   : > { %v524_v8 = vor.u32 %v549_v6, %v523_v5  ;;  %v525_v10 = vld [vmem:[%s186_s8 + $0x20] sm:$0xf0]  ;;  %v222_v11 = vld [vmem:[%s195_s30] sm:$0x1]  ;;  %v550_v15 = vld [vmem:[%s186_s8 + $0x24] sm:$0xf0] }
  0x32   : > { %271 = vmatpush.bf16.msra.mxu0 %v516_v3  ;;  %v528_v12 = vor.u32 %v546_v9, %v525_v10  ;;  %v223_v13 = vpack.c.bf16 %v222_v11, %v222_v11  ;;  %v531_v14 = vld [vmem:[%s186_s8 + $0x10] sm:$0xf]  ;;  %v547_v16 = vld [vmem:[%s186_s8 + $0x14] sm:$0xf]  ;;  %284 = vmatpush.bf16.msra.mxu1 %v520_v7  ;;  %v533_v18 = vld [vmem:[%s186_s8 + $0x28] sm:$0xf0] }
  0x33   : > { %297 = vmatpush.bf16.msra.mxu2 %v524_v8  ;;  %v532_v17 = vor.u32 %v550_v15, %v531_v14  ;;  %v343_v19 = vsel %vm342_vm1, %v222_v11, 0.0  ;;  %v536_v20 = vor.u32 %v547_v16, %v533_v18  ;;  %s557_s5 = smul.u32 12, %s791_s12  ;;  %vm365_vm2 = vcmask 1040384   ;;  %s382_s17 = scalar_lea.sflag [#allocation4], %s935_s26 }
  0x34   : > { %310 = vmatpush.bf16.msra.mxu3 %v528_v12  ;;  %344 = vadd.xlane.f32.xlu0 %v343_v19  ;;  %s555_s27 = smul.u32 6, %s935_s26  ;;  %vm369_vm3 = vcmask 1043459   ;;  %vm367_vm4 = vcmask 1041408   ;;  %vm371_vm5 = vcmask 1044483   ;;  %vm373_vm6 = vcmask 1042432   ;;  %s725_s20 = scalar_lea.hbm %s1006_s2, 96 }
  0x35   : > { %537 = vmatmul.msk.bf16.vlgmr.msra.gmra.mxu0 %vm260_vm0, %v223_v13  ;;  %538 = vmatmul.msk.bf16.vlgmr.msra.gmra.mxu1 %vm260_vm0, %v223_v13  ;;  %s393_s23 = sadd.s32 %s557_s5, %s556_s24  ;;  %vm378_vm7 = vcmp.lt.s32.totalorder %v376_v40, 768 }
  0x36   : > { %539 = vmatmul.msk.bf16.vlgmr.msra.gmra.mxu2 %vm260_vm0, %v223_v13  ;;  %323 = vmatpush.bf16.msrb.mxu0 %v532_v17  ;;  %s394_s6 = scalar_lea.hbm %s1006_s2, %s393_s23  ;;  %s220_s12 = scalar_lea.vmem [#allocation7], %s555_s27 }
  0x37   : > { %336 = vmatpush.bf16.msrb.mxu1 %v536_v20  ;;  %540 = vmatmul.msk.bf16.vlgmr.msra.gmra.mxu3 %vm260_vm0, %v223_v13  ;;  %s396_s13 = sshll.u32 %s220_s12, 4  ;;  %s962_s7 = sshll.u32 %s394_s6, 4  ;;  %s397_s13 = int_to_ptr.vmem [resolvable:$true] %s396_s13  ;;  %s399_s7 = int_to_ptr.hbm [resolvable:$true] %s962_s7 }
  0x38   : > { %s719_s18 = sshra.s32 %s399_s7, 4  ;;  %s720_s18 = int_to_ptr.hbm [resolvable:$true] %s719_s18 }
  0x39   : > { %s721_s22 = scalar_lea.hbm %s720_s18, 6  ;;  %p726_p7 = scmp.lt.s32.totalorder %s720_s18, %s1006_s2 }
  0x3a   : > { %p722_p4 = scmp.ne.s32.totalorder %s720_s18, %s721_s22  ;;  %p727_p8 = scmp.lt.s32.totalorder %s725_s20, %s721_s22 }
  0x3c   : > { %p723_p5 = pnand %p722_p4, %p891_p9  ;;  %p728_p10 = por %p727_p8, %p726_p7 }
  0x3e   : > { %p724_p6 = pneg %p723_p5 }
  0x40   : > { %p729_p11 = pnand %p728_p10, %p724_p6 }
  0x45   : > { %541 = vmatmul.msk.bf16.vlgmr.msrb.gmra.mxu0 %vm260_vm0, %v223_v13  ;;  %542 = vmatmul.msk.bf16.vlgmr.msrb.gmra.mxu1 %vm260_vm0, %v223_v13 }
  0xa7   : > { %v345_v21 = vpop.xlane.xlu0 %344 }
  0xa8   : > { %v346_v22 = vmax.f32 %v345_v21, 1.0 }
  0xaa   : > { %643 = vrcp.f32 %v346_v22 }
  0xb0   : > { %v644_v29 = vpop.eup %643 }
  0xb2   : > { %v273_v23 = vpop.f32.mrf.mxu0  ;;  %v286_v24 = vpop.f32.mrf.mxu1 }
  0xb3   : > { %v349_v30 = vmul.f32 %v644_v29, %v286_v24  ;;  %v348_v43 = vmul.f32 %v644_v29, %v273_v23 }
  0xb5   : > { %v360_v35 = vrot.slane %v349_v30, 7 }
  0xb7   : > { %v366_v46 = vsel %vm365_vm2, %v348_v43, %v360_v35 }
  0xb9   : > { %v299_v25 = vpop.f32.mrf.mxu2 }
  0xba   : > { %v275_v26 = vpop.f32.mrf.mxu0  ;;  %v288_v27 = vpop.f32.mrf.mxu1  ;;  %v350_v32 = vmul.f32 %v644_v29, %v299_v25 }
  0xbb   : > { %v312_v28 = vpop.f32.mrf.mxu3 }
  0xbc   : > { %v351_v31 = vmul.f32 %v644_v29, %v312_v28  ;;  %v361_v41 = vrot.slane %v350_v32, 6 }
  0xbe   : > { %v362_v36 = vrot.slane %v351_v31, 5  ;;  %v368_v48 = vsel %vm367_vm4, %v366_v46, %v361_v41 }
  0xc1   : > { %v301_v33 = vpop.f32.mrf.mxu2 }
  0xc2   : > { %v325_v34 = vpop.f32.mrf.mxu0  ;;  %v338_v39 = vpop.f32.mrf.mxu1 }
  0xc3   : > { %v314_v37 = vpop.f32.mrf.mxu3  ;;  %v352_v38 = vmul.f32 %v644_v29, %v325_v34  ;;  %v353_v42 = vmul.f32 %v644_v29, %v338_v39 }
  0xc5   : > { %v363_v44 = vrot.slane %v352_v38, 4  ;;  %v364_v45 = vrot.slane %v353_v42, 3 }
  0xc7   : > { %v370_v47 = vsel %vm369_vm3, %v362_v36, %v363_v44 }
  0xc8   : > { %v372_v49 = vsel %vm371_vm5, %v370_v47, %v364_v45 }
  0xc9   : > { %v374_v50 = vsel %vm373_vm6, %v368_v48, %v372_v49 }
  0xca   : > { %v327_v51 = vpop.f32.mrf.mxu0  ;;  %380 = vst.msk [vmem:[%s220_s12] sm:$0x3f] %vm378_vm7, %v374_v50  ;;  %v340_v52 = vpop.f32.mrf.mxu1 }
  0xcb   : > { %732 = shalt.err (!%p729_p11)
}
  0xcc   : > { %562 = dma.vmem_to_hbm [thread:$0]  (%p891_p9), %s397_s13, 96, %s399_s7, %s382_s17  }
  0xcd PF: > { %p576_p13 = scmp.ge.s32.totalorder %s807_s16, 2  ;;  %s410_s26 = sand.u32 1, %s779_s9  }
  0xce   : > { %s411_s30 = scalar_lea.sflag [#allocation4], %s410_s26 }
  0xcf   : > { %p572_p0 = pnand %p576_p13, %p897_p12 }
  0xd1   : > { %p573_p1 = pneg %p572_p0 }
  0xd3   : > { %774 = dma.done.wait (%p573_p1), %s411_s30, 96  }
  0xd4   : > { %776 = vsyncadd (%p573_p1), %s411_s30, 4294967200  ;;  %s21_s16 = sadd.s32 1, %s807_s16   ;;  %s1017_s24 = sld [smem:[#allocation13_spill]] }
  0xd5   : > { %p18_p2 = scmp.ge.s32.totalorder %s21_s16, 18   ;;  %s1018_s25 = sld [smem:[#allocation11_spill]] }
  0xd6   : > { %s1019_s5 = sld [smem:[#allocation12_spill]]  ;;  %s1020_s9 = smov %s783_s10 }
  0xd7   : > { %s1021_s10 = smov %s787_s11  ;;  %s1023_s12 = smov %s799_s14 }
  0xd8   : > { %s1024_s13 = smov %s803_s15  ;;  %20 = sbr.rel (!%p18_p2) target bundleno = 9 (0x9), region = 86 }
  0xda   : > { %s1022_s11 = smov %s1017_s24 }
  0xdb   : > { %s1025_s14 = smov %s1018_s25 }
  0xdc   : > { %s1026_s15 = smov %s1019_s5 }
  0xdd   :  { %417 = vsyncpa [#allocation3], 1 }
  0xde   :  { %419 = vsyncpa [#allocation3 + $0x1], 1 }
  0xdf   :  { %420 = vsyncpa [#allocation6], 1 }
  0xe0   :  { %422 = vsyncpa [#allocation6 + $0x1], 1 }
  0xe1   :  { %423 = vsyncpa [#allocation4], 1 }
  0xe2   :  { %425 = vsyncpa [#allocation4 + $0x1], 1 }

</bundles_post_ra>
